<compile_context>
chip_gen: v7x
topology: tpu7x:2x2x1
jax: 0.10.0
libtpu: 0.0.40
codegen_flags: <defaults>
</compile_context>

<pallas_src>
import functools

import jax
import jax.numpy as jnp
from jax import lax
from jax.experimental import pallas as pl
from jax.experimental.pallas import tpu as pltpu


def _round_up(n, m):
    return ((n + m - 1) // m) * m


def _chan_ln_kernel(x_ref, g_ref, o_ref, *, eps, inv_c):
    # x_ref block: (1, C, TILE_S); g_ref block: (C, 1); o_ref block: (1, C, TILE_S)
    x = x_ref[0].astype(jnp.float32)                         # (C, TILE_S)
    # Two-pass, numerically stable channel statistics (x already in VMEM).
    mean = jnp.sum(x, axis=0, keepdims=True) * inv_c          # (1, TILE_S)
    centered = x - mean                                        # (C, TILE_S)
    var = jnp.sum(centered * centered, axis=0, keepdims=True) * inv_c
    inv = lax.rsqrt(jnp.maximum(var, eps))                     # clamp(min=eps).rsqrt()
    g = g_ref[...].astype(jnp.float32)                         # (C, 1) broadcasts over lanes
    o_ref[0] = (centered * inv * g).astype(o_ref.dtype)


def chan_layer_norm(x, g, *, vmem_limit_bytes=48 << 20):
    """x: (B, C, F, H, W), g: (C, 1, 1, 1). Returns same shape/dtype as x."""
    B, C, F, H, W = x.shape
    S = F * H * W
    eps = 1e-5 if x.dtype == jnp.float32 else 1e-3

    # Zero-copy layouts: channel on sublanes, F*H*W on lanes.
    xk = x.reshape(B, C, S)
    gk = g.reshape(C, 1)

    # ---- Tile sizing ---------------------------------------------------
    itemsize = jnp.dtype(x.dtype).itemsize
    # Sublane packing: 8 rows for 32-bit, 16 for 16-bit, 32 for 8-bit dtypes.
    pack = 8 * max(1, 4 // itemsize)
    c_pad = _round_up(C, pack)

    # Per lane-column VMEM cost of one grid step:
    #   2x input + 2x output double-buffered blocks  -> 4 * c_pad * itemsize
    #   ~2 full-block f32 intermediates in the kernel -> 2 * c_pad * 4
    per_col_bytes = 4 * c_pad * itemsize + 2 * c_pad * 4
    budget = int(vmem_limit_bytes * 0.80)  # headroom for internal scratch
    tile_s_max = max(128, (budget // per_col_bytes) // 128 * 128)

    if S <= tile_s_max:
        tile_s = S                       # full lane extent is always legal
        n_tiles = 1
    else:
        # Balance tiles: near-even divisor of S, multiple of 128.
        n_tiles = pl.cdiv(S, tile_s_max)
        tile_s = _round_up(pl.cdiv(S, n_tiles), 128)
        n_tiles = pl.cdiv(S, tile_s)

    # Make sure the grid has >=2 steps so v7x's two TensorCores both work.
    if B * n_tiles < 2 and S >= 256:
        tile_s = _round_up(pl.cdiv(S, 2), 128)
        n_tiles = pl.cdiv(S, tile_s)

    grid = (B, n_tiles)

    # Advisory cost hint so XLA can overlap surrounding ops.
    cost = pl.CostEstimate(
        flops=6 * B * C * S,
        transcendentals=B * S,
        bytes_accessed=2 * B * C * S * itemsize + C * jnp.dtype(g.dtype).itemsize,
    )

    out = pl.pallas_call(
        functools.partial(_chan_ln_kernel, eps=eps, inv_c=1.0 / C),
        out_shape=jax.ShapeDtypeStruct((B, C, S), x.dtype),
        grid_spec=pltpu.PrefetchScalarGridSpec(
            num_scalar_prefetch=0,
            grid=grid,
            in_specs=[
                pl.BlockSpec((1, C, tile_s), lambda b, t: (b, 0, t)),
                pl.BlockSpec((C, 1), lambda b, t: (0, 0)),  # g resident across steps
            ],
            out_specs=pl.BlockSpec((1, C, tile_s), lambda b, t: (b, 0, t)),
        ),
        compiler_params=pltpu.CompilerParams(
            dimension_semantics=("parallel", "parallel"),
            vmem_limit_bytes=vmem_limit_bytes,
        ),
        cost_estimate=cost,
    )(xk, gk)

    # Free reshape back to (B, C, F, H, W).
    return out.reshape(B, C, F, H, W)


def _reference(x, g):
    eps = 1e-5 if x.dtype == jnp.float32 else 1e-3
    mean = jnp.mean(x, axis=1, keepdims=True)
    var = jnp.mean((x - mean) ** 2, axis=1, keepdims=True)
    return (x - mean) * lax.rsqrt(jnp.maximum(var, eps)) * g[None, ...]


if __name__ == "__main__":
    key = jax.random.PRNGKey(0)
    kx, kg = jax.random.split(key)

    B, C, F, H, W = 2, 4, 3, 8, 16
    x = jax.random.normal(kx, (B, C, F, H, W), dtype=jnp.float32)

    # Module init: nn.Parameter(torch.ones(dim, 1, 1, 1))
    g_ones = jnp.ones((C, 1, 1, 1), dtype=jnp.float32)
    out = jax.block_until_ready(chan_layer_norm(x, g_ones))
    ref = _reference(x, g_ones)
    assert out.shape == x.shape and out.dtype == x.dtype
    assert jnp.allclose(out, ref, atol=1e-5, rtol=1e-5)

    # Extra check with a non-trivial (deterministic) gain to exercise scaling.
    g_var = 0.5 + jax.random.uniform(kg, (C, 1, 1, 1), dtype=jnp.float32)
    out2 = jax.block_until_ready(chan_layer_norm(x, g_var))
    ref2 = _reference(x, g_var)
    assert jnp.allclose(out2, ref2, atol=1e-5, rtol=1e-5)

    print("KERNEL_OK")
</pallas_src>

<mosaic_0001>
module attributes {stable_mosaic.version = 11 : i64} {
  func.func @_chan_ln_kernel(%arg0: i32, %arg1: i32, %arg2: memref<1x4x384xf32, #tpu.memory_space<vmem>>, %arg3: memref<4x1xf32, #tpu.memory_space<vmem>>, %arg4: memref<1x4x384xf32, #tpu.memory_space<vmem>>) attributes {dimension_semantics = [#tpu.dimension_semantics<parallel>, #tpu.dimension_semantics<parallel>], iteration_bounds = array<i64: 2, 1>, scalar_prefetch = 0 : i64, scratch_operands = 0 : i64, tpu.core_type = #tpu.core_type<tc>, window_params = [{transform_indices = @transform_0, window_bounds = array<i64: 1, 4, 384>}, {pipeline_mode = #tpu.pipeline_mode<synchronous>, transform_indices = @transform_1, window_bounds = array<i64: 4, 1>}, {transform_indices = @transform_2, window_bounds = array<i64: 1, 4, 384>}]} {
    %c0 = arith.constant 0 : index
    %c0_0 = arith.constant 0 : index
    %c0_1 = arith.constant 0 : index
    %0 = vector.load %arg2[%c0, %c0_0, %c0_1] : memref<1x4x384xf32, #tpu.memory_space<vmem>>, vector<1x4x384xf32>
    %1 = vector.shape_cast %0 : vector<1x4x384xf32> to vector<4x384xf32>
    %cst = arith.constant dense<0.000000e+00> : vector<384xf32>
    %2 = vector.multi_reduction <add>, %1, %cst [0] : vector<4x384xf32> to vector<384xf32>
    %3 = vector.shape_cast %2 : vector<384xf32> to vector<1x384xf32>
    %cst_2 = arith.constant 2.500000e-01 : f32
    %4 = vector.broadcast %cst_2 : f32 to vector<1x384xf32>
    %5 = arith.mulf %3, %4 : vector<1x384xf32>
    %6 = vector.broadcast %5 : vector<1x384xf32> to vector<4x384xf32>
    %7 = arith.subf %1, %6 : vector<4x384xf32>
    %8 = arith.mulf %7, %7 : vector<4x384xf32>
    %cst_3 = arith.constant dense<0.000000e+00> : vector<384xf32>
    %9 = vector.multi_reduction <add>, %8, %cst_3 [0] : vector<4x384xf32> to vector<384xf32>
    %10 = vector.shape_cast %9 : vector<384xf32> to vector<1x384xf32>
    %cst_4 = arith.constant 2.500000e-01 : f32
    %11 = vector.broadcast %cst_4 : f32 to vector<1x384xf32>
    %12 = arith.mulf %10, %11 : vector<1x384xf32>
    %cst_5 = arith.constant 9.99999974E-6 : f32
    %13 = vector.broadcast %cst_5 : f32 to vector<1x384xf32>
    %14 = arith.maximumf %12, %13 : vector<1x384xf32>
    %15 = math.rsqrt %14 : vector<1x384xf32>
    %c0_6 = arith.constant 0 : index
    %c0_7 = arith.constant 0 : index
    %16 = vector.load %arg3[%c0_6, %c0_7] : memref<4x1xf32, #tpu.memory_space<vmem>>, vector<4x1xf32>
    %17 = vector.broadcast %15 : vector<1x384xf32> to vector<4x384xf32>
    %18 = arith.mulf %7, %17 : vector<4x384xf32>
    %19 = vector.broadcast %16 : vector<4x1xf32> to vector<4x384xf32>
    %20 = arith.mulf %18, %19 : vector<4x384xf32>
    %c0_8 = arith.constant 0 : index
    %c0_9 = arith.constant 0 : index
    %c0_10 = arith.constant 0 : index
    %21 = vector.load %arg4[%c0_8, %c0_9, %c0_10] : memref<1x4x384xf32, #tpu.memory_space<vmem>>, vector<1x4x384xf32>
    %22 = vector.shape_cast %21 : vector<1x4x384xf32> to vector<4x384xf32>
    %23 = vector.shape_cast %20 : vector<4x384xf32> to vector<1x4x384xf32>
    tpu.vector_store %arg4[%c0_8, %c0_9, %c0_10], %23 {strides = array<i32>} : memref<1x4x384xf32, #tpu.memory_space<vmem>>, vector<1x4x384xf32>,
    return
  }
  func.func @transform_0(%arg0: i32, %arg1: i32) -> (i32, i32, i32) {
    %c0_i32 = arith.constant 0 : i32
    %c0_i32_0 = arith.constant 0 : i32
    return %arg0, %c0_i32, %arg1 : i32, i32, i32
  }
  func.func @transform_1(%arg0: i32, %arg1: i32) -> (i32, i32) {
    %c0_i32 = arith.constant 0 : i32
    %c0_i32_0 = arith.constant 0 : i32
    %c0_i32_1 = arith.constant 0 : i32
    return %c0_i32, %c0_i32_0 : i32, i32
  }
  func.func @transform_2(%arg0: i32, %arg1: i32) -> (i32, i32, i32) {
    %c0_i32 = arith.constant 0 : i32
    %c0_i32_0 = arith.constant 0 : i32
    return %arg0, %c0_i32, %arg1 : i32, i32, i32
  }
}

</mosaic_0001>

<bundles_post_ra>
// kernel: tpu_custom_call.1
= control target key start
LH: loop header
LB: loop body
LE: loop exit
PB: predicated region body
PF: predicated region fallthrough
CT: control target
= control target key end

     0   :  { %7 = vsyncpa [#allocation3], 0  ;;  %s776_s0 = inlined_call_operand.hbm [shape: f32[2,4,384], index: 0, kind: input, shape index: {}]   ;;  %s777_s1 = inlined_call_operand.vmem [shape: f32[4,1], index: 1, kind: input, shape index: {}]   ;;  %s778_s2 = inlined_call_operand.hbm [shape: f32[2,4,384], index: 2, kind: output, shape index: {}]  }
   0x1   :  { %9 = vsyncpa [#allocation3 + $0x1], 0 }
   0x2   :  { %10 = vsyncpa [#allocation4], 0 }
   0x3   :  { %12 = vsyncpa [#allocation4 + $0x1], 0  ;;  %s593_s9 = smov 0   ;;  %s595_s10 = smov 0  }
   0x4   :  { %s597_s11 = smov 0   ;;  %s599_s12 = smov 0  }
   0x5   :  { %s601_s13 = smov 0   ;;  %s603_s14 = smov 0  }
   0x6 LB: > { %s375_s15 = sadd.s32 4294967295, %s572_s14   ;;  %s376_s16 = sadd.s32 4294967294, %s572_s14   ;;  %s572_s14 = sphi %s603_s14, %s18_s14   ;;  %s568_s13 = sphi %s601_s13, %s793_s13   ;;  %s564_s12 = sphi %s599_s12, %s792_s12   ;;  %s560_s11 = sphi %s597_s11, %s791_s11   ;;  %s556_s10 = sphi %s595_s10, %s790_s10   ;;  %s552_s9 = sphi %s593_s9, %s789_s9  }
   0x7   : > { %s30_s17 = sadd.s32 1, %s568_s13  ;;  %s39_s18 = sadd.s32 1, %s560_s11 }
   0x8   : > { %p32_p0 = scmp.ge.s32.totalorder %s30_s17, 2  ;;  %p46_p1 = scmp.ne.s32.totalorder %s560_s11, %s556_s10 }
   0x9   : > { %p47_p2 = scmp.eq.s32.totalorder %s572_s14, 0  ;;  %p52_p3 = scmp.ne.s32.totalorder %s556_s10, %s552_s9 }
   0xa   : > { %s795_s17 = smov (%p32_p0, %s30_s17), 0  ;;  %p53_p5 = scmp.eq.s32.totalorder %s375_s15, 0 }
   0xb   : > { %p634_p4 = por %p47_p2, %p46_p1  ;;  %s34_s20 = ssub.s32 %s568_s13, %s795_s17 }
   0xc   : > { %p99_p6 = scmp.eq.s32.totalorder %s375_s15, 1  ;;  %p37_p7 = scmp.eq.s32.totalorder %s34_s20, 0 }
   0xd   : > { %p640_p8 = por %p53_p5, %p52_p3  ;;  %p105_p10 = scmp.eq.s32.totalorder %s376_s16, 1 }
   0xe   : > { %p644_p9 = por %p99_p6, %p46_p1  ;;  %p400_p13 = scmp.lt.s32.totalorder %s572_s14, 2 }
   0xf   : > { %s649_s23 = scalar_select %p37_p7, %s560_s11, %s39_s18  }
  0x10   : > { %s782_s22 = scalar_select %p644_p9, 1, 0 }
  0x11   : > { %p651_p11 = por %p105_p10, %p52_p3  ;;  %s128_s25 = sand.u32 1, %s560_s11  }
  0x12   : > { %s384_s26 = smul.u32 12, %s128_s25  ;;  %p661_p0 = pnand %p400_p13, %p634_p4 }
  0x13   : > { %s783_s24 = scalar_select %p651_p11, 1, 0 }
  0x14   : > { %s385_s27 = smul.u32 192, %s568_s13  ;;  %s132_s4 = scalar_lea.vmem [#allocation2], %s384_s26 }
  0x15   : > { %s142_s5 = sshll.u32 %s132_s4, 4  ;;  %s129_s6 = scalar_lea.sflag [#allocation3], %s128_s25  ;;  %s671_s5 = int_to_ptr.vmem [resolvable:$true] %s142_s5 }
  0x16   : > { %s669_s3 = scalar_lea.hbm %s776_s0, %s385_s27  ;;  %p462_p3 = pneg %p661_p0 }
  0x17   : > { %s460_s7 = scalar_lea.hbm %s669_s3, 192  ;;  %s465_s16 = scalar_lea.hbm %s776_s0, 384 }
  0x18   : > { %p461_p2 = scmp.ne.s32.totalorder %s669_s3, %s460_s7  ;;  %p466_p6 = scmp.lt.u32.totalorder %s669_s3, %s776_s0 }
  0x19   : > { %p467_p7 = scmp.lt.u32.totalorder %s465_s16, %s460_s7  ;;  %p469_p13 = scmp.lt.u32.totalorder %s460_s7, %s669_s3 }
  0x1a   : > { %p463_p4 = pnand %p462_p3, %p461_p2 }
  0x1b   : > { %p468_p10 = por %p467_p7, %p466_p6 }
  0x1c   : > { %p464_p5 = pneg %p463_p4 }
  0x1d   : > { %p470_p12 = por %p469_p13, %p468_p10 }
  0x1f   : > { %p471_p1 = pnand %p470_p12, %p464_p5 }
  0x21   : > { %474 = shalt.err (!%p471_p1)
}
  0x22   : > { %s475_s20 = scalar_lea.vmem %s671_s5, 192  ;;  %s574_s25 = smov [#allocation2]  }
  0x23   : > { %p476_p2 = scmp.ne.s32.totalorder %s671_s5, %s475_s20  ;;  %s480_s26 = sshll.u32 %s574_s25, 4  ;;  %s481_s26 = int_to_ptr.vmem [resolvable:$false] %s480_s26 }
  0x24   : > { %s482_s27 = scalar_lea.vmem %s481_s26, 384  ;;  %p483_p9 = scmp.lt.s32.totalorder %s671_s5, %s481_s26 }
  0x25   : > { %p478_p4 = pnand %p476_p2, %p462_p3  ;;  %p484_p6 = scmp.lt.s32.totalorder %s482_s27, %s475_s20 }
  0x27   : > { %p479_p11 = pneg %p478_p4  ;;  %p485_p7 = por %p484_p6, %p483_p9 }
  0x29   : > { %p486_p10 = pnand %p485_p7, %p479_p11 }
  0x2b   : > { %489 = shalt.err (!%p486_p10)
}
  0x2c   : > { %395 = dma.hbm_to_vmem [thread:$0]  (!%p661_p0), %s669_s3, 192, %s671_s5, %s129_s6  }
  0x2d   : > { %p147_p12 = scmp.lt.s32.totalorder %s572_s14, 3  ;;  %p785_p1 = scmp.ge.s32.totalorder %s572_s14, 1 }
  0x2f   : > { %p148_p3 = pnand %p785_p1, %p147_p12 }
  0x30   : > { %s702_s29 = sand.u32 (!%p148_p3), 1, %s556_s10  }
  0x31   : > { %151 = sbr.rel (%p148_p3) target bundleno = 205 (0xcd), region = 28  ;;  %s154_s4 = scalar_lea.sflag (!%p148_p3), [#allocation3], %s702_s29 }
  0x32   : > { %s386_s30 = smul.u32 (!%p148_p3), 12, %s702_s29 }
  0x34   : > { %s157_s28 = scalar_lea.vmem (!%p148_p3), [#allocation2], %s386_s30 }
  0x38   : > { %543 = dma.done.wait (%p640_p8), %s154_s4, 192  }
  0x39   : > { %545 = vsyncadd (%p640_p8), %s154_s4, 4294967104  ;;  %v575_v0 = vmov 0   ;;  %v251_v1 = vld [vmem:[%s777_s1] sm:$0xf]  ;;  %vm185_vm0 = vcmask 1043456   ;;  %s387_s21 = smul.u32 192, %s564_s12 }
  0x3a   : > { %452 = vset.pattern.permute.xlu0 %v575_v0  ;;  %v180_v2 = vld [vmem:[%s157_s28] sm:$0xff]  ;;  %v181_v10 = vld [vmem:[%s157_s28 + $0x8] sm:$0xf]  ;;  %v576_v62 = vmov 839922192   ;;  %v265_v0 = vlaneseq  ;;  %s177_s6 = scalar_lea.vmem [#allocation5], %s386_s30 }
  0x3b   : > { %260 = vperm.xlu0 %452, %v251_v1   ;;  %v183_v3 = vcombine.high %v180_v2, %v180_v2  ;;  %v186_v4 = vsel %vm185_vm0, %v180_v2, 0.0  ;;  %v200_v13 = vsel %vm185_vm0, %v181_v10, 0.0  ;;  %v263_v63 = vunpack.c.l.s4 %v576_v62  ;;  %s291_s7 = sshll.u32 %s177_s6, 4  ;;  %s727_s16 = scalar_lea.hbm %s778_s2, %s387_s21  ;;  %s729_s7 = int_to_ptr.vmem [resolvable:$true] %s291_s7 }
  0x3c   : > { %v187_v6 = vrot.slane %v186_v4, 4  ;;  %v201_v16 = vrot.slane %v200_v13, 4  ;;  %s275_s12 = scalar_lea.sflag [#allocation4], %s702_s29  ;;  %s490_s18 = scalar_lea.vmem %s729_s7, 192 }
  0x3d   : > { %v193_v5 = vsel %vm185_vm0, %v183_v3, 0.0  ;;  %v264_v3 = vunpack.c.0.s8 %v263_v63  ;;  %p491_p8 = scmp.ne.s32.totalorder %s729_s7, %s490_s18  ;;  %p786_p9 = scmp.ne.s32.totalorder %s782_s22, 0 }
  0x3e   : > { %v194_v7 = vrot.slane %v193_v5, 4  ;;  %v188_v8 = vadd.f32 %v187_v6, %v186_v4  ;;  %v202_v19 = vadd.f32 %v201_v16, %v200_v13  ;;  %v266_v4 = vshrl.u32 %v265_v0, 7  ;;  %s577_s19 = smov [#allocation5]  }
  0x3f   : > { %p492_p11 = pnand %p491_p8, %p786_p9  ;;  %s494_s20 = sshll.u32 %s577_s19, 4  ;;  %s495_s20 = int_to_ptr.vmem [resolvable:$false] %s494_s20 }
  0x40   : > { %v195_v9 = vadd.f32 %v194_v7, %v193_v5  ;;  %v189_v11 = vrot.slane %v188_v8, 2  ;;  %v203_v22 = vrot.slane %v202_v19, 2  ;;  %v267_v7 = vsub.s32 %v264_v3, %v266_v4  ;;  %s496_s25 = scalar_lea.vmem %s495_s20, 384  ;;  %p497_p5 = scmp.lt.s32.totalorder %s729_s7, %s495_s20 }
  0x41   : > { %p493_p0 = pneg %p492_p11  ;;  %p498_p13 = scmp.lt.s32.totalorder %s496_s25, %s490_s18 }
  0x42   : > { %v196_v12 = vrot.slane %v195_v9, 2  ;;  %v190_v14 = vadd.f32 %v189_v11, %v188_v8  ;;  %v204_v23 = vadd.f32 %v203_v22, %v202_v19 }
  0x43   : > { %p499_p2 = por %p498_p13, %p497_p5 }
  0x44   : > { %v197_v15 = vadd.f32 %v196_v12, %v195_v9  ;;  %v191_v17 = vrot.slane %v190_v14, 1  ;;  %v205_v26 = vrot.slane %v204_v23, 1 }
  0x45   : > { %p500_p4 = pnand %p499_p2, %p493_p0 }
  0x46   : > { %v198_v18 = vrot.slane %v197_v15, 1  ;;  %v192_v20 = vadd.f32 %v191_v17, %v190_v14  ;;  %v206_v28 = vadd.f32 %v205_v26, %v204_v23 }
  0x48   : > { %v199_v21 = vadd.f32 %v198_v18, %v197_v15  ;;  %v207_v24 = vmul.f32 0.25, %v192_v20  ;;  %v209_v30 = vmul.f32 0.25, %v206_v28 }
  0x4a   : > { %v208_v25 = vmul.f32 0.25, %v199_v21  ;;  %v215_v32 = vsub.f32 %v181_v10, %v209_v30 }
  0x4c   : > { %v212_v27 = vcombine.low %v207_v24, %v208_v25  ;;  %v217_v35 = vmul.f32 %v215_v32, %v215_v32 }
  0x4e   : > { %v214_v29 = vsub.f32 %v180_v2, %v212_v27  ;;  %v235_v39 = vsel %vm185_vm0, %v217_v35, 0.0 }
  0x4f   : > { %v236_v42 = vrot.slane %v235_v39, 4 }
  0x50   : > { %v216_v31 = vmul.f32 %v214_v29, %v214_v29 }
  0x51   : > { %v237_v45 = vadd.f32 %v236_v42, %v235_v39 }
  0x52   : > { %v219_v33 = vcombine.high %v216_v31, %v216_v31  ;;  %v221_v34 = vsel %vm185_vm0, %v216_v31, 0.0 }
  0x53   : > { %v222_v37 = vrot.slane %v221_v34, 4  ;;  %v238_v48 = vrot.slane %v237_v45, 2 }
  0x54   : > { %v228_v36 = vsel %vm185_vm0, %v219_v33, 0.0 }
  0x55   : > { %v229_v38 = vrot.slane %v228_v36, 4  ;;  %v223_v40 = vadd.f32 %v222_v37, %v221_v34  ;;  %v239_v51 = vadd.f32 %v238_v48, %v237_v45 }
  0x57   : > { %v230_v41 = vadd.f32 %v229_v38, %v228_v36  ;;  %v224_v43 = vrot.slane %v223_v40, 2  ;;  %v240_v54 = vrot.slane %v239_v51, 1 }
  0x59   : > { %v231_v44 = vrot.slane %v230_v41, 2  ;;  %v225_v46 = vadd.f32 %v224_v43, %v223_v40  ;;  %v241_v56 = vadd.f32 %v240_v54, %v239_v51 }
  0x5b   : > { %v232_v47 = vadd.f32 %v231_v44, %v230_v41  ;;  %v226_v49 = vrot.slane %v225_v46, 1  ;;  %v244_v59 = vmul.f32 0.25, %v241_v56 }
  0x5d   : > { %v233_v50 = vrot.slane %v232_v47, 1  ;;  %v227_v52 = vadd.f32 %v226_v49, %v225_v46  ;;  %v247_v61 = vmax.f32 %v244_v59, 1e-05 }
  0x5f   : > { %v234_v53 = vadd.f32 %v233_v50, %v232_v47  ;;  %v242_v55 = vmul.f32 0.25, %v227_v52 }
  0x61   : > { %v243_v57 = vmul.f32 0.25, %v234_v53  ;;  %v245_v58 = vmax.f32 %v242_v55, 1e-05 }
  0x63   : > { %v246_v60 = vmax.f32 %v243_v57, 1e-05  ;;  %454 = vrsqrt.f32 %v245_v58 }
  0x65   : > { %456 = vrsqrt.f32 %v246_v60 }
  0x66   : > { %458 = vrsqrt.f32 %v247_v61 }
  0x6d   : > { %v455_v1 = vpop.eup %454 }
  0x6f   : > { %v457_v2 = vpop.eup %456 }
  0x70   : > { %v254_v5 = vcombine.low %v455_v1, %v457_v2  ;;  %v459_v6 = vpop.eup %458 }
  0x71   : > { %v257_v9 = vmul.f32 %v459_v6, %v215_v32 }
  0x72   : > { %v256_v8 = vmul.f32 %v254_v5, %v214_v29 }
  0xba   : > { %v261_v10 = vpop.permute.xlu0 %260 }
  0xbb   : > { %v268_v11 = vrot.slane %v261_v10, %v267_v7 }
  0xbd   : > { %v270_v12 = vmul.f32 %v268_v11, %v256_v8  ;;  %v271_v13 = vmul.f32 %v268_v11, %v257_v9 }
  0xbf   : > { %272 = vst [vmem:[%s177_s6] sm:$0xff] %v270_v12  ;;  %273 = vst [vmem:[%s177_s6 + $0x8] sm:$0xf] %v271_v13 }
  0xc0   : > { %503 = shalt.err (!%p500_p4)
}
  0xc1   : > { %s504_s26 = scalar_lea.hbm %s727_s16, 192  ;;  %s508_s30 = scalar_lea.hbm %s778_s2, 384 }
  0xc2   : > { %p505_p6 = scmp.ne.s32.totalorder %s727_s16, %s504_s26  ;;  %p509_p12 = scmp.lt.u32.totalorder %s727_s16, %s778_s2 }
  0xc3   : > { %p510_p1 = scmp.lt.u32.totalorder %s508_s30, %s504_s26  ;;  %p512_p8 = scmp.lt.u32.totalorder %s504_s26, %s727_s16 }
  0xc4   : > { %p506_p7 = pnand %p505_p6, %p786_p9 }
  0xc5   : > { %p511_p3 = por %p510_p1, %p509_p12 }
  0xc6   : > { %p507_p10 = pneg %p506_p7 }
  0xc7   : > { %p513_p11 = por %p512_p8, %p511_p3 }
  0xc9   : > { %p514_p0 = pnand %p513_p11, %p507_p10 }
  0xcb   : > { %517 = shalt.err (!%p514_p0)
}
  0xcc   : > { %390 = dma.vmem_to_hbm [thread:$0]  (%p786_p9), %s729_s7, 192, %s727_s16, %s275_s12  }
  0xcd PF: > { %s303_s3 = sand.u32 1, %s552_s9   ;;  %p787_p5 = scmp.ne.s32.totalorder %s783_s24, 0 }
  0xce   : > { %p788_p13 = scmp.ge.s32.totalorder %s572_s14, 2  ;;  %s304_s5 = scalar_lea.sflag [#allocation4], %s303_s3 }
  0xd0   : > { %p397_p2 = pnand %p788_p13, %p787_p5 }
  0xd2   : > { %547 = dma.done.wait (!%p397_p2), %s304_s5, 192  }
  0xd3   : > { %549 = vsyncadd (!%p397_p2), %s304_s5, 4294967104  ;;  %s18_s14 = sadd.s32 1, %s572_s14   ;;  %s789_s9 = smov %s556_s10 }
  0xd4   : > { %p15_p4 = scmp.ge.s32.totalorder %s18_s14, 4   ;;  %s790_s10 = smov %s560_s11 }
  0xd5   : > { %s791_s11 = smov %s649_s23  ;;  %s792_s12 = smov %s568_s13 }
  0xd6   : > { %s793_s13 = smov %s795_s17  ;;  %17 = sbr.rel (!%p15_p4) target bundleno = 6 (0x6), region = 73 }
  0xdd   :  { %309 = vsyncpa [#allocation3], 1 }
  0xde   :  { %311 = vsyncpa [#allocation3 + $0x1], 1 }
  0xdf   :  { %312 = vsyncpa [#allocation4], 1 }
  0xe0   :  { %314 = vsyncpa [#allocation4 + $0x1], 1 }

</bundles_post_ra>
